<compile_context>
chip_gen: v7x
topology: tpu7x:2x2x1
jax: 0.10.0
libtpu: 0.0.40
codegen_flags: <defaults>
</compile_context>

<pallas_src>
import jax
import jax.numpy as jnp
from jax.experimental import pallas as pl
from jax.experimental.pallas import tpu as pltpu

LANES = 128          # vreg lane width
MIN_LANE_TILE = 1024  # 8 sublanes x 128 lanes: grid-path tile granularity


def _round_up(a, m):
    return ((a + m - 1) // m) * m


def linear_kernel(w_ref, b_ref, x_ref, o_ref):
    """y^T = W @ x^T + b with the batch on the lane axis.

    w_ref: SMEM (OUT*IN,)  flattened weight, torch (OUT, IN) order, f32
    b_ref: SMEM (OUT,)     bias, f32
    x_ref: VMEM (IN,  TBS, 128)  activations, batch folded into (TBS, 128)
    o_ref: VMEM (OUT, TBS, 128)  output, same batch folding
    """
    out_f = o_ref.shape[0]
    in_f = x_ref.shape[0]

    # Load the IN feature planes once; each is a dense (TBS, 128) tile.
    x_planes = []
    for k in range(in_f):
        xk = x_ref[k]
        if xk.dtype != jnp.float32:
            xk = xk.astype(jnp.float32)
        x_planes.append(xk)

    # Tiny contraction (IN=2): unrolled scalar-splat FMAs on the VPU.
    for o in range(out_f):
        acc = w_ref[o * in_f] * x_planes[0]
        for k in range(1, in_f):
            acc = acc + w_ref[o * in_f + k] * x_planes[k]
        acc = acc + b_ref[o]
        if o_ref.dtype != jnp.float32:
            acc = acc.astype(o_ref.dtype)
        o_ref[o] = acc


def _to_lane_major(x, bp):
    """(B, IN) -> (IN, bp//128, 128), zero-padded along the batch axis."""
    B, in_f = x.shape
    xt = x.T                                             # (IN, B)
    if bp != B:
        xt = jnp.zeros((in_f, bp), x.dtype).at[:, :B].set(xt)
    return xt.reshape(in_f, bp // LANES, LANES)


def _from_lane_major(y3, B):
    """(OUT, bp//128, 128) -> (B, OUT)."""
    out_f = y3.shape[0]
    return y3.reshape(out_f, -1)[:, :B].T


def linear_pallas(x, weight, bias, *, batch_tile=131072):
    """y = x @ weight.T + bias  (weight: (OUT, IN) torch convention)."""
    B, IN = x.shape
    OUT, IN2 = weight.shape
    assert IN == IN2 and bias.shape == (OUT,)

    # Parameters become 9 SMEM scalars (no padded/transposed VMEM blocks).
    w_flat = weight.reshape(-1).astype(jnp.float32)      # (OUT*IN,)
    b_vec = bias.astype(jnp.float32)                     # (OUT,)

    smem = pl.BlockSpec(memory_space=pltpu.MemorySpace.SMEM)
    vmem = pl.BlockSpec(memory_space=pltpu.MemorySpace.VMEM)

    if B <= batch_tile:
        # Gridless path: whole (tiny) tensors live in VMEM, no pipeline setup.
        bp = _round_up(B, LANES)
        x3 = _to_lane_major(x, bp)
        y3 = pl.pallas_call(
            linear_kernel,
            out_shape=jax.ShapeDtypeStruct((OUT, bp // LANES, LANES), x.dtype),
            in_specs=[smem, smem, vmem],
            out_specs=vmem,
        )(w_flat, b_vec, x3)
        return _from_lane_major(y3, B)

    # Grid path: tile only the batch (lane) axis with a near-even,
    # 1024-aligned split so ragged B costs at most ~1 tile-granule of padding.
    nb = pl.cdiv(B, batch_tile)
    tb = _round_up(pl.cdiv(B, nb), MIN_LANE_TILE)        # elems per grid step
    bp = nb * tb
    tbs = tb // LANES                                    # sublane rows per step
    x3 = _to_lane_major(x, bp)

    # Per-step VMEM = double-buffered (IN+OUT)*tb*itemsize.  At the default
    # tile this is ~5 MiB (fits every generation's default scoped VMEM: v5e
    # 16 MiB, v6e/v7x 32 MiB); only override the limit for huge custom tiles,
    # and keep headroom under v7x's 64 MiB physical VMEM.
    block_bytes = (IN + OUT) * tb * x.dtype.itemsize
    params = {"dimension_semantics": ("parallel",)}      # v7x: shard across 2 TCs
    if 2 * block_bytes > 12 * (1 << 20):
        params["vmem_limit_bytes"] = int(min(4 * block_bytes + (4 << 20),
                                             48 * (1 << 20)))

    y3 = pl.pallas_call(
        linear_kernel,
        out_shape=jax.ShapeDtypeStruct((OUT, bp // LANES, LANES), x.dtype),
        grid=(nb,),
        in_specs=[
            smem,
            smem,
            pl.BlockSpec((IN, tbs, LANES), lambda i: (0, i, 0)),
        ],
        out_specs=pl.BlockSpec((OUT, tbs, LANES), lambda i: (0, i, 0)),
        compiler_params=pltpu.CompilerParams(**params),
    )(w_flat, b_vec, x3)
    return _from_lane_major(y3, B)


if __name__ == "__main__":
    key = jax.random.PRNGKey(0)
    k_x, k_w, k_b, k_x2, k_x3 = jax.random.split(key, 5)

    IN_FEATURES, OUT_FEATURES = 2, 3

    # Deterministic init (mimics torch's U(-1/sqrt(fan_in), 1/sqrt(fan_in)))
    bound = 1.0 / (IN_FEATURES ** 0.5)
    weight = jax.random.uniform(
        k_w, (OUT_FEATURES, IN_FEATURES), jnp.float32, -bound, bound
    )
    bias = jax.random.uniform(k_b, (OUT_FEATURES,), jnp.float32, -bound, bound)

    # Small batch -> gridless lane-major path.
    x = jax.random.normal(k_x, (8, IN_FEATURES), jnp.float32)
    out = linear_pallas(x, weight, bias)
    jax.block_until_ready(out)
    ref = x @ weight.T + bias
    assert out.shape == (8, OUT_FEATURES)
    assert jnp.allclose(out, ref, atol=1e-5, rtol=1e-5)

    # Aligned larger batch -> exercises the gridded "parallel" path
    # (small tile here just to exercise the grid machinery in the test).
    x_big = jax.random.normal(k_x2, (4096, IN_FEATURES), jnp.float32)
    out_big = linear_pallas(x_big, weight, bias, batch_tile=1024)
    jax.block_until_ready(out_big)
    ref_big = x_big @ weight.T + bias
    assert out_big.shape == (4096, OUT_FEATURES)
    assert jnp.allclose(out_big, ref_big, atol=1e-5, rtol=1e-5)

    # Ragged batch -> exercises the near-even tile split + tail padding.
    x_rag = jax.random.normal(k_x3, (5000, IN_FEATURES), jnp.float32)
    out_rag = linear_pallas(x_rag, weight, bias, batch_tile=2048)
    jax.block_until_ready(out_rag)
    ref_rag = x_rag @ weight.T + bias
    assert out_rag.shape == (5000, OUT_FEATURES)
    assert jnp.allclose(out_rag, ref_rag, atol=1e-5, rtol=1e-5)

    print("KERNEL_OK")
</pallas_src>

<mosaic_0001>
module attributes {stable_mosaic.version = 11 : i64} {
  func.func @linear_kernel(%arg0: memref<6xf32, #tpu.memory_space<smem>>, %arg1: memref<3xf32, #tpu.memory_space<smem>>, %arg2: memref<2x1x128xf32, #tpu.memory_space<vmem>>, %arg3: memref<3x1x128xf32, #tpu.memory_space<vmem>>) attributes {dimension_semantics = [], scalar_prefetch = 0 : i64, scratch_operands = 0 : i64, tpu.core_type = #tpu.core_type<tc>} {
    %c0 = arith.constant 0 : index
    %c0_0 = arith.constant 0 : index
    %c0_1 = arith.constant 0 : index
    %0 = vector.load %arg2[%c0, %c0_0, %c0_1] : memref<2x1x128xf32, #tpu.memory_space<vmem>>, vector<1x1x128xf32>
    %1 = vector.shape_cast %0 : vector<1x1x128xf32> to vector<1x128xf32>
    %c1 = arith.constant 1 : index
    %c0_2 = arith.constant 0 : index
    %c0_3 = arith.constant 0 : index
    %2 = vector.load %arg2[%c1, %c0_2, %c0_3] : memref<2x1x128xf32, #tpu.memory_space<vmem>>, vector<1x1x128xf32>
    %3 = vector.shape_cast %2 : vector<1x1x128xf32> to vector<1x128xf32>
    %c0_4 = arith.constant 0 : index
    %4 = memref.load %arg0[%c0_4] : memref<6xf32, #tpu.memory_space<smem>>
    %5 = vector.broadcast %4 : f32 to vector<1x128xf32>
    %6 = arith.mulf %5, %1 : vector<1x128xf32>
    %c1_5 = arith.constant 1 : index
    %7 = memref.load %arg0[%c1_5] : memref<6xf32, #tpu.memory_space<smem>>
    %8 = vector.broadcast %7 : f32 to vector<1x128xf32>
    %9 = arith.mulf %8, %3 : vector<1x128xf32>
    %10 = arith.addf %6, %9 : vector<1x128xf32>
    %c0_6 = arith.constant 0 : index
    %11 = memref.load %arg1[%c0_6] : memref<3xf32, #tpu.memory_space<smem>>
    %12 = vector.broadcast %11 : f32 to vector<1x128xf32>
    %13 = arith.addf %10, %12 : vector<1x128xf32>
    %c0_7 = arith.constant 0 : index
    %c0_8 = arith.constant 0 : index
    %c0_9 = arith.constant 0 : index
    %14 = vector.load %arg3[%c0_7, %c0_8, %c0_9] : memref<3x1x128xf32, #tpu.memory_space<vmem>>, vector<1x1x128xf32>
    %15 = vector.shape_cast %14 : vector<1x1x128xf32> to vector<1x128xf32>
    %16 = vector.shape_cast %13 : vector<1x128xf32> to vector<1x1x128xf32>
    tpu.vector_store %arg3[%c0_7, %c0_8, %c0_9], %16 {strides = array<i32>} : memref<3x1x128xf32, #tpu.memory_space<vmem>>, vector<1x1x128xf32>,
    %c2 = arith.constant 2 : index
    %17 = memref.load %arg0[%c2] : memref<6xf32, #tpu.memory_space<smem>>
    %18 = vector.broadcast %17 : f32 to vector<1x128xf32>
    %19 = arith.mulf %18, %1 : vector<1x128xf32>
    %c3 = arith.constant 3 : index
    %20 = memref.load %arg0[%c3] : memref<6xf32, #tpu.memory_space<smem>>
    %21 = vector.broadcast %20 : f32 to vector<1x128xf32>
    %22 = arith.mulf %21, %3 : vector<1x128xf32>
    %23 = arith.addf %19, %22 : vector<1x128xf32>
    %c1_10 = arith.constant 1 : index
    %24 = memref.load %arg1[%c1_10] : memref<3xf32, #tpu.memory_space<smem>>
    %25 = vector.broadcast %24 : f32 to vector<1x128xf32>
    %26 = arith.addf %23, %25 : vector<1x128xf32>
    %c1_11 = arith.constant 1 : index
    %c0_12 = arith.constant 0 : index
    %c0_13 = arith.constant 0 : index
    %27 = vector.load %arg3[%c1_11, %c0_12, %c0_13] : memref<3x1x128xf32, #tpu.memory_space<vmem>>, vector<1x1x128xf32>
    %28 = vector.shape_cast %27 : vector<1x1x128xf32> to vector<1x128xf32>
    %29 = vector.shape_cast %26 : vector<1x128xf32> to vector<1x1x128xf32>
    tpu.vector_store %arg3[%c1_11, %c0_12, %c0_13], %29 {strides = array<i32>} : memref<3x1x128xf32, #tpu.memory_space<vmem>>, vector<1x1x128xf32>,
    %c4 = arith.constant 4 : index
    %30 = memref.load %arg0[%c4] : memref<6xf32, #tpu.memory_space<smem>>
    %31 = vector.broadcast %30 : f32 to vector<1x128xf32>
    %32 = arith.mulf %31, %1 : vector<1x128xf32>
    %c5 = arith.constant 5 : index
    %33 = memref.load %arg0[%c5] : memref<6xf32, #tpu.memory_space<smem>>
    %34 = vector.broadcast %33 : f32 to vector<1x128xf32>
    %35 = arith.mulf %34, %3 : vector<1x128xf32>
    %36 = arith.addf %32, %35 : vector<1x128xf32>
    %c2_14 = arith.constant 2 : index
    %37 = memref.load %arg1[%c2_14] : memref<3xf32, #tpu.memory_space<smem>>
    %38 = vector.broadcast %37 : f32 to vector<1x128xf32>
    %39 = arith.addf %36, %38 : vector<1x128xf32>
    %c2_15 = arith.constant 2 : index
    %c0_16 = arith.constant 0 : index
    %c0_17 = arith.constant 0 : index
    %40 = vector.load %arg3[%c2_15, %c0_16, %c0_17] : memref<3x1x128xf32, #tpu.memory_space<vmem>>, vector<1x1x128xf32>
    %41 = vector.shape_cast %40 : vector<1x1x128xf32> to vector<1x128xf32>
    %42 = vector.shape_cast %39 : vector<1x128xf32> to vector<1x1x128xf32>
    tpu.vector_store %arg3[%c2_15, %c0_16, %c0_17], %42 {strides = array<i32>} : memref<3x1x128xf32, #tpu.memory_space<vmem>>, vector<1x1x128xf32>,
    return
  }
}

</mosaic_0001>

<bundles_post_ra>
// kernel: tpu_custom_call.1
= control target key start
LH: loop header
LB: loop body
LE: loop exit
PB: predicated region body
PF: predicated region fallthrough
CT: control target
= control target key end

     0   :  { %8 = vsyncpa [#allocation4], 0  ;;  %s215_s0 = inlined_call_operand.hbm [shape: f32[6], index: 0, kind: input, shape index: {}]   ;;  %s216_s1 = inlined_call_operand.vmem [shape: f32[3], index: 1, kind: input, shape index: {}]   ;;  %s217_s2 = inlined_call_operand.vmem [shape: f32[2,1,128], index: 2, kind: input, shape index: {}]   ;;  %s218_s3 = inlined_call_operand.hbm [shape: f32[3,1,128], index: 3, kind: output, shape index: {}]  }
   0x1   :  { %9 = vsyncpa [#allocation5], 0 }
   0x2   :  { %10 = vsyncpa [#allocation3], 0  ;;  %s25_s14 = sshll.u32 %s216_s1, 4  ;;  %s107_s17 = scalar_lea.hbm %s215_s0, 16  ;;  %s26_s14 = int_to_ptr.vmem [resolvable:$true] %s25_s14 }
   0x3   :  { %p108_p0 = scmp.ne.s32.totalorder %s215_s0, %s107_s17  ;;  %p111_p1 = scmp.lt.u32.totalorder %s107_s17, %s215_s0 }
   0x5   :  { %p113_p2 = pnand %p111_p1, %p108_p0 }
   0x7   :  { %116 = shalt.err (!%p113_p2)
}
   0x8   :  { %s157_s22 = smov [#allocation2]   ;;  %s117_s1 = scalar_lea.vmem %s26_s14, 16 }
   0x9   :  { %18 = dma.hbm_to_smem %s215_s0, 16, %s157_s22, [#allocation4]  }
   0xa   :  { %p118_p3 = scmp.ne.s32.totalorder %s26_s14, %s117_s1  ;;  %p122_p4 = scmp.lt.s32.totalorder %s26_s14, %s26_s14 }
   0xb   :  { %p123_p5 = scmp.lt.s32.totalorder %s117_s1, %s117_s1 }
   0xd   :  { %p124_p6 = por %p123_p5, %p122_p4 }
   0xf   :  { %p125_p7 = pnand %p124_p6, %p118_p3 }
  0x11   :  { %128 = shalt.err (!%p125_p7)
}
  0x12   :  { %s158_s25 = smov [#allocation6]  }
  0x13   :  { %28 = dma.vmem_to_smem %s26_s14, 16, %s158_s25, [#allocation5]  }
  0x14   :  { %151 = dma.done.wait [#allocation4], 16  }
  0x15   :  { %152 = vsyncadd [#allocation4], 4294967280 }
  0x16   :  { %153 = dma.done.wait [#allocation5], 16  }
  0x17   :  { %154 = vsyncadd [#allocation5], 4294967280 }
  0x18   :  { %37 = sfence }
  0x19   :  { %s41_s26 = sld [smem:[#allocation2]]  ;;  %s95_s27 = sld [smem:[#allocation2 + $0x1]]  ;;  %v38_v0 = vld [vmem:[%s217_s2] sm:$0x1]  ;;  %v94_v1 = vld [vmem:[%s217_s2 + $0x1] sm:$0x1] }
  0x1a   :  { %s48_s28 = sld [smem:[#allocation6]]  ;;  %s96_s29 = sld [smem:[#allocation2 + $0x2]] }
  0x1b   :  { %s97_s0 = sld [smem:[#allocation2 + $0x3]]  ;;  %s98_s30 = sld [smem:[#allocation6 + $0x1]] }
  0x1c   :  { %s99_s4 = sld [smem:[#allocation2 + $0x4]]  ;;  %s100_s7 = sld [smem:[#allocation2 + $0x5]] }
  0x1d   :  { %s101_s8 = sld [smem:[#allocation6 + $0x2]]  ;;  %s159_s11 = smov [#allocation7]  }
  0x1e   :  { %s81_s2 = sshll.u32 %s159_s11, 4  ;;  %s82_s2 = int_to_ptr.vmem [resolvable:$true] %s81_s2 }
  0x1f   :  { %v42_v2 = vstv %s41_s26  ;;  %v45_v4 = vstv %s95_s27  ;;  %s129_s12 = scalar_lea.vmem %s82_s2, 48  ;;  %s133_s13 = scalar_lea.vmem %s82_s2, 64 }
  0x20   :  { %v43_v3 = vmul.f32 %v42_v2, %v38_v0  ;;  %v46_v5 = vmul.f32 %v94_v1, %v45_v4  ;;  %v53_v6 = vstv %s96_s29  ;;  %v49_v8 = vstv %s48_s28  ;;  %p130_p8 = scmp.ne.s32.totalorder %s82_s2, %s129_s12  ;;  %p134_p9 = scmp.lt.s32.totalorder %s82_s2, %s82_s2 }
  0x21   :  { %v56_v7 = vstv %s97_s0  ;;  %v54_v9 = vmul.f32 %v53_v6, %v38_v0  ;;  %v60_v13 = vstv %s98_s30  ;;  %p135_p10 = scmp.lt.s32.totalorder %s133_s13, %s129_s12 }
  0x22   :  { %v57_v10 = vmul.f32 %v94_v1, %v56_v7  ;;  %v65_v11 = vstv %s99_s4  ;;  %v47_v12 = vadd.f32 %v46_v5, %v43_v3  ;;  %v68_v15 = vstv %s100_s7 }
  0x23   :  { %v66_v14 = vmul.f32 %v65_v11, %v38_v0  ;;  %v69_v17 = vmul.f32 %v94_v1, %v68_v15  ;;  %v72_v19 = vstv %s101_s8  ;;  %p136_p11 = por %p135_p10, %p134_p9 }
  0x24   :  { %v58_v16 = vadd.f32 %v57_v10, %v54_v9  ;;  %v50_v18 = vadd.f32 %v49_v8, %v47_v12 }
  0x25   :  { %v70_v21 = vadd.f32 %v69_v17, %v66_v14  ;;  %p137_p12 = pnand %p136_p11, %p130_p8 }
  0x26   :  { %v61_v20 = vadd.f32 %v60_v13, %v58_v16  ;;  %51 = vst [vmem:[#allocation7] sm:$0x1] %v50_v18 }
  0x27   :  { %v73_v22 = vadd.f32 %v72_v19, %v70_v21 }
  0x28   :  { %63 = vst [vmem:[#allocation7 + $0x1] sm:$0x1] %v61_v20 }
  0x29   :  { %75 = vst [vmem:[#allocation7 + $0x2] sm:$0x1] %v73_v22 }
  0x2a   :  { %140 = shalt.err (!%p137_p12)
}
  0x2b   :  { %s141_s16 = scalar_lea.hbm %s218_s3, 48 }
  0x2c   :  { %p142_p13 = scmp.ne.s32.totalorder %s218_s3, %s141_s16  ;;  %p145_p0 = scmp.lt.u32.totalorder %s141_s16, %s218_s3 }
  0x2e   :  { %p147_p1 = pnand %p145_p0, %p142_p13 }
  0x30   :  { %150 = shalt.err (!%p147_p1)
}
  0x31   :  { %s160_s21 = smov 16   ;;  %s161_s22 = smov 1  }
  0x32   :  { %87 = dma.vmem_to_hbm [thread:$0]  %s82_s2, 48, %s218_s3, [#allocation3], %s160_s21, %s160_s21, %s161_s22  }
  0x33   :  { %155 = dma.done.wait [#allocation3], 48  }
  0x34   :  { %156 = vsyncadd [#allocation3], 4294967248 }
  0x35   :  { %91 = vsyncpa [#allocation3], 1 }
  0x36   :  { %92 = vsyncpa [#allocation4], 1 }
  0x37   :  { %93 = vsyncpa [#allocation5], 1 }

</bundles_post_ra>
